<compile_context>
chip_gen: v5e
topology: v5e:2x2
jax: 0.10.0
libtpu: 0.0.40
codegen_flags: <defaults>
</compile_context>

<pallas_src>
import jax
import jax.numpy as jnp
from jax.experimental import pallas as pl
from jax.experimental.pallas import tpu as pltpu


def _round_up(x, m):
    return (x + m - 1) // m * m


def encoder_kernel(x_ref, w1_ref, b1_ref, wh_ref, bh_ref, out_ref, h_acc):
    k = pl.program_id(1)

    @pl.when(k == 0)
    def _():
        h_acc[...] = jnp.zeros_like(h_acc)

    # Partial hidden-layer matmul over this K tile (bf16 operands, f32 acc).
    h_acc[...] += jnp.dot(x_ref[...], w1_ref[...],
                          preferred_element_type=jnp.float32)

    @pl.when(k == pl.num_programs(1) - 1)
    def _():
        # f32 epilogue: bias add + ReLU (biases read once per M tile).
        h = jnp.maximum(h_acc[...] + b1_ref[...], 0.0)
        # Fused mean|var head: one wide MXU pass, one lane-dense store.
        out = jnp.dot(h.astype(wh_ref.dtype), wh_ref[...],
                      preferred_element_type=jnp.float32)
        out_ref[...] = (out + bh_ref[...]).astype(out_ref.dtype)


def encoder_forward(x, w1, b1, wm, bm, wv, bv, *, tile_m=256, tile_k=512):
    """x: (B, n_input) f32; weights (in, out); biases (1, out). Returns (mu, var)."""
    B, K = x.shape
    H = w1.shape[1]
    N = wm.shape[1]

    # Fuse mean/var heads into a single lane-dense matmul.
    wh = jnp.concatenate([wm, wv], axis=1)          # (H, 2N)
    bh = jnp.concatenate([bm, bv], axis=1)          # (1, 2N)

    # TPU-friendly padded shapes.
    tile_m = min(tile_m, _round_up(B, 16))          # covers f32(8)/bf16(16) sublane
    B_pad = _round_up(B, tile_m)
    tile_k = min(tile_k, _round_up(K, 128))
    K_pad = _round_up(K, tile_k)
    H_pad = _round_up(H, 128)
    N2_pad = _round_up(2 * N, 128)

    # bf16 matmul operands (f32 accumulation in-kernel); biases stay f32.
    xp = jnp.zeros((B_pad, K_pad), jnp.bfloat16).at[:B, :K].set(
        x.astype(jnp.bfloat16))
    w1p = jnp.zeros((K_pad, H_pad), jnp.bfloat16).at[:K, :H].set(
        w1.astype(jnp.bfloat16))
    b1p = jnp.zeros((1, H_pad), jnp.float32).at[:, :H].set(b1)
    whp = jnp.zeros((H_pad, N2_pad), jnp.bfloat16).at[:H, :2 * N].set(
        wh.astype(jnp.bfloat16))
    bhp = jnp.zeros((1, N2_pad), jnp.float32).at[:, :2 * N].set(bh)

    grid = (B_pad // tile_m, K_pad // tile_k)

    flops = 2 * B_pad * K_pad * H_pad + 2 * B_pad * H_pad * N2_pad
    bytes_accessed = (xp.size * 2 + w1p.size * 2 + whp.size * 2
                      + b1p.size * 4 + bhp.size * 4 + B_pad * N2_pad * 4)

    out = pl.pallas_call(
        encoder_kernel,
        out_shape=jax.ShapeDtypeStruct((B_pad, N2_pad), jnp.float32),
        grid_spec=pltpu.PrefetchScalarGridSpec(
            num_scalar_prefetch=0,
            grid=grid,
            in_specs=[
                pl.BlockSpec((tile_m, tile_k), lambda i, k: (i, k)),  # x tile
                pl.BlockSpec((tile_k, H_pad), lambda i, k: (k, 0)),   # W1 K-slab
                pl.BlockSpec((1, H_pad), lambda i, k: (0, 0)),        # b1 (resident)
                pl.BlockSpec((H_pad, N2_pad), lambda i, k: (0, 0)),   # Wm|Wv (resident)
                pl.BlockSpec((1, N2_pad), lambda i, k: (0, 0)),       # bm|bv (resident)
            ],
            out_specs=pl.BlockSpec((tile_m, N2_pad), lambda i, k: (i, 0)),
            scratch_shapes=[pltpu.VMEM((tile_m, H_pad), jnp.float32)],
        ),
        compiler_params=pltpu.CompilerParams(
            dimension_semantics=("parallel", "arbitrary"),
        ),
        cost_estimate=pl.CostEstimate(
            flops=flops, transcendentals=0, bytes_accessed=bytes_accessed),
    )(xp, w1p, b1p, whp, bhp)

    mu = out[:B, :N]
    var = out[:B, N:2 * N]
    return mu, var


def init_params(key, n_input, n_hidden, n_output):
    """Mimics PyTorch nn.Linear defaults U(-1/sqrt(fan_in), +1/sqrt(fan_in))."""
    k1, k2, k3, k4 = jax.random.split(key, 4)
    lim1 = 1.0 / jnp.sqrt(n_input)
    limm = 1.0 / jnp.sqrt(n_hidden)
    w1 = jax.random.uniform(k1, (n_input, n_hidden), jnp.float32, -lim1, lim1)
    b1 = jax.random.uniform(k2, (1, n_hidden), jnp.float32, -lim1, lim1)
    wm = jax.random.uniform(k3, (n_hidden, n_output), jnp.float32, -limm, limm)
    bm = jax.random.uniform(k4, (1, n_output), jnp.float32, -limm, limm)
    # var_layer weight/bias explicitly zeroed in Encoder.__init__
    wv = jnp.zeros((n_hidden, n_output), jnp.float32)
    bv = jnp.zeros((1, n_output), jnp.float32)
    return w1, b1, wm, bm, wv, bv


def reference_forward(x, w1, b1, wm, bm, wv, bv):
    h = jnp.maximum(x @ w1 + b1, 0.0)
    return h @ wm + bm, h @ wv + bv


if __name__ == "__main__":
    # Small, deliberately "awkward" shapes to exercise all padding paths.
    B, n_input, n_hidden, n_output = 6, 48, 32, 10

    key = jax.random.PRNGKey(0)
    kx, kp = jax.random.split(key)
    x = jax.random.normal(kx, (B, n_input), jnp.float32)
    params = init_params(kp, n_input, n_hidden, n_output)

    mu, var = encoder_forward(x, *params)
    jax.block_until_ready((mu, var))

    mu_ref, var_ref = reference_forward(x, *params)
    assert mu.shape == (B, n_output) and var.shape == (B, n_output)
    # bf16 matmul operands -> relaxed tolerance vs f32 reference.
    assert jnp.allclose(mu, mu_ref, atol=2e-2, rtol=2e-2)
    assert jnp.allclose(var, var_ref, atol=2e-2, rtol=2e-2)

    print("KERNEL_OK")
</pallas_src>

<mosaic_0001>
module attributes {stable_mosaic.version = 11 : i64} {
  func.func @encoder_kernel(%arg0: i32, %arg1: i32, %arg2: memref<16x128xbf16, #tpu.memory_space<vmem>>, %arg3: memref<128x128xbf16, #tpu.memory_space<vmem>>, %arg4: memref<1x128xf32, #tpu.memory_space<vmem>>, %arg5: memref<128x128xbf16, #tpu.memory_space<vmem>>, %arg6: memref<1x128xf32, #tpu.memory_space<vmem>>, %arg7: memref<16x128xf32, #tpu.memory_space<vmem>>, %arg8: memref<16x128xf32, #tpu.memory_space<vmem>>) attributes {dimension_semantics = [#tpu.dimension_semantics<parallel>, #tpu.dimension_semantics<arbitrary>], iteration_bounds = array<i64: 1, 1>, scalar_prefetch = 0 : i64, scratch_operands = 1 : i64, tpu.core_type = #tpu.core_type<tc>, window_params = [{transform_indices = @transform_0, window_bounds = array<i64: 16, 128>}, {transform_indices = @transform_1, window_bounds = array<i64: 128, 128>}, {pipeline_mode = #tpu.pipeline_mode<synchronous>, transform_indices = @transform_2, window_bounds = array<i64: 1, 128>}, {pipeline_mode = #tpu.pipeline_mode<synchronous>, transform_indices = @transform_3, window_bounds = array<i64: 128, 128>}, {pipeline_mode = #tpu.pipeline_mode<synchronous>, transform_indices = @transform_4, window_bounds = array<i64: 1, 128>}, {transform_indices = @transform_5, window_bounds = array<i64: 16, 128>}]} {
    %c0_i32 = arith.constant 0 : i32
    %0 = arith.cmpi eq, %arg1, %c0_i32 : i32
    %1 = arith.extui %0 : i1 to i32
    %c0_i32_0 = arith.constant 0 : i32
    %2 = arith.cmpi ne, %1, %c0_i32_0 : i32
    scf.if %2 {
      %cst_10 = arith.constant 0.000000e+00 : f32
      %12 = vector.broadcast %cst_10 : f32 to vector<16x128xf32>
      %c0_11 = arith.constant 0 : index
      %c0_12 = arith.constant 0 : index
      %13 = vector.load %arg8[%c0_11, %c0_12] : memref<16x128xf32, #tpu.memory_space<vmem>>, vector<16x128xf32>
      tpu.vector_store %arg8[%c0_11, %c0_12], %12 {strides = array<i32>} : memref<16x128xf32, #tpu.memory_space<vmem>>, vector<16x128xf32>,
    } else {
    }
    %c0 = arith.constant 0 : index
    %c0_1 = arith.constant 0 : index
    %3 = vector.load %arg8[%c0, %c0_1] : memref<16x128xf32, #tpu.memory_space<vmem>>, vector<16x128xf32>
    %c0_2 = arith.constant 0 : index
    %c0_3 = arith.constant 0 : index
    %4 = vector.load %arg2[%c0_2, %c0_3] : memref<16x128xbf16, #tpu.memory_space<vmem>>, vector<16x128xbf16>
    %c0_4 = arith.constant 0 : index
    %c0_5 = arith.constant 0 : index
    %5 = vector.load %arg3[%c0_4, %c0_5] : memref<128x128xbf16, #tpu.memory_space<vmem>>, vector<128x128xbf16>
    %cst = arith.constant dense<0.000000e+00> : vector<16x128xf32>
    %6 = tpu.matmul %4, %5, %cst {dimension_numbers = #tpu.dot_dimension_numbers<[1], [0], [0], [1], [0, 0, 1, 1], [], []>} : vector<16x128xbf16>, vector<128x128xbf16>, vector<16x128xf32> -> vector<16x128xf32>
    %7 = arith.addf %3, %6 : vector<16x128xf32>
    %c0_6 = arith.constant 0 : index
    %c0_7 = arith.constant 0 : index
    %8 = vector.load %arg8[%c0_6, %c0_7] : memref<16x128xf32, #tpu.memory_space<vmem>>, vector<16x128xf32>
    tpu.vector_store %arg8[%c0_6, %c0_7], %7 {strides = array<i32>} : memref<16x128xf32, #tpu.memory_space<vmem>>, vector<16x128xf32>,
    %c0_i32_8 = arith.constant 0 : i32
    %9 = arith.cmpi eq, %arg1, %c0_i32_8 : i32
    %10 = arith.extui %9 : i1 to i32
    %c0_i32_9 = arith.constant 0 : i32
    %11 = arith.cmpi ne, %10, %c0_i32_9 : i32
    scf.if %11 {
      %c0_10 = arith.constant 0 : index
      %c0_11 = arith.constant 0 : index
      %12 = vector.load %arg8[%c0_10, %c0_11] : memref<16x128xf32, #tpu.memory_space<vmem>>, vector<16x128xf32>
      %c0_12 = arith.constant 0 : index
      %c0_13 = arith.constant 0 : index
      %13 = vector.load %arg4[%c0_12, %c0_13] : memref<1x128xf32, #tpu.memory_space<vmem>>, vector<1x128xf32>
      %14 = vector.broadcast %13 : vector<1x128xf32> to vector<16x128xf32>
      %15 = arith.addf %12, %14 : vector<16x128xf32>
      %cst_14 = arith.constant 0.000000e+00 : f32
      %16 = vector.broadcast %cst_14 : f32 to vector<16x128xf32>
      %17 = arith.maximumf %15, %16 : vector<16x128xf32>
      %18 = arith.truncf %17 : vector<16x128xf32> to vector<16x128xbf16>
      %c0_15 = arith.constant 0 : index
      %c0_16 = arith.constant 0 : index
      %19 = vector.load %arg5[%c0_15, %c0_16] : memref<128x128xbf16, #tpu.memory_space<vmem>>, vector<128x128xbf16>
      %cst_17 = arith.constant dense<0.000000e+00> : vector<16x128xf32>
      %20 = tpu.matmul %18, %19, %cst_17 {dimension_numbers = #tpu.dot_dimension_numbers<[1], [0], [0], [1], [0, 0, 1, 1], [], []>} : vector<16x128xbf16>, vector<128x128xbf16>, vector<16x128xf32> -> vector<16x128xf32>
      %c0_18 = arith.constant 0 : index
      %c0_19 = arith.constant 0 : index
      %21 = vector.load %arg6[%c0_18, %c0_19] : memref<1x128xf32, #tpu.memory_space<vmem>>, vector<1x128xf32>
      %22 = vector.broadcast %21 : vector<1x128xf32> to vector<16x128xf32>
      %23 = arith.addf %20, %22 : vector<16x128xf32>
      %c0_20 = arith.constant 0 : index
      %c0_21 = arith.constant 0 : index
      %24 = vector.load %arg7[%c0_20, %c0_21] : memref<16x128xf32, #tpu.memory_space<vmem>>, vector<16x128xf32>
      tpu.vector_store %arg7[%c0_20, %c0_21], %23 {strides = array<i32>} : memref<16x128xf32, #tpu.memory_space<vmem>>, vector<16x128xf32>,
    } else {
    }
    return
  }
  func.func @transform_0(%arg0: i32, %arg1: i32) -> (i32, i32) {
    %c0_i32 = arith.constant 0 : i32
    return %arg0, %arg1 : i32, i32
  }
  func.func @transform_1(%arg0: i32, %arg1: i32) -> (i32, i32) {
    %c0_i32 = arith.constant 0 : i32
    %c0_i32_0 = arith.constant 0 : i32
    return %arg1, %c0_i32 : i32, i32
  }
  func.func @transform_2(%arg0: i32, %arg1: i32) -> (i32, i32) {
    %c0_i32 = arith.constant 0 : i32
    %c0_i32_0 = arith.constant 0 : i32
    %c0_i32_1 = arith.constant 0 : i32
    return %c0_i32, %c0_i32_0 : i32, i32
  }
  func.func @transform_3(%arg0: i32, %arg1: i32) -> (i32, i32) {
    %c0_i32 = arith.constant 0 : i32
    %c0_i32_0 = arith.constant 0 : i32
    %c0_i32_1 = arith.constant 0 : i32
    return %c0_i32, %c0_i32_0 : i32, i32
  }
  func.func @transform_4(%arg0: i32, %arg1: i32) -> (i32, i32) {
    %c0_i32 = arith.constant 0 : i32
    %c0_i32_0 = arith.constant 0 : i32
    %c0_i32_1 = arith.constant 0 : i32
    return %c0_i32, %c0_i32_0 : i32, i32
  }
  func.func @transform_5(%arg0: i32, %arg1: i32) -> (i32, i32) {
    %c0_i32 = arith.constant 0 : i32
    %c0_i32_0 = arith.constant 0 : i32
    return %arg0, %c0_i32 : i32, i32
  }
}

</mosaic_0001>

<bundles_post_ra>
// kernel: tpu_custom_call.1
= control target key start
LH: loop header
LB: loop body
LE: loop exit
PB: predicated region body
PF: predicated region fallthrough
CT: control target
= control target key end

     0   :  { %10 = vsyncpa [#allocation4], 0  ;;  %s537_s0 = inlined_call_operand.hbm [shape: bf16[16,128], index: 0, kind: input, shape index: {}]   ;;  %s538_s1 = inlined_call_operand.hbm [shape: bf16[128,128], index: 1, kind: input, shape index: {}]   ;;  %s539_s2 = inlined_call_operand.vmem [shape: f32[1,128], index: 2, kind: input, shape index: {}]   ;;  %s540_s3 = inlined_call_operand.hbm [shape: bf16[128,128], index: 3, kind: input, shape index: {}]   ;;  %s541_s4 = inlined_call_operand.vmem [shape: f32[1,128], index: 4, kind: input, shape index: {}]   ;;  %s542_s5 = inlined_call_operand.hbm [shape: f32[16,128], index: 5, kind: output, shape index: {}]  }
   0x1   :  { %11 = vsyncpa [#allocation7], 0 }
   0x2   :  { %12 = vsyncpa [#allocation5], 0  ;;  %s30_s20 = sshll.u32 %s538_s1, 4  ;;  %s481_s21 = smov [#allocation6]   ;;  %s31_s20 = int_to_ptr.hbm [resolvable:$true] %s30_s20 }
   0x3   :  { %s32_s22 = sshll.u32 %s481_s21, 4  ;;  %s17_s25 = sshll.u32 %s537_s0, 4  ;;  %s33_s22 = int_to_ptr.vmem [resolvable:$true] %s32_s22  ;;  %s18_s25 = int_to_ptr.hbm [resolvable:$true] %s17_s25 }
   0x4   :  { %s482_s26 = smov 64   ;;  %s483_s27 = smov 4  }
   0x5   :  { %38 = dma.hbm_to_vmem [thread:$0]  %s31_s20, 1024, %s33_s22, [#allocation7], %s482_s26, %s482_s26, %s483_s27  }
   0x6   :  { %s484_s28 = smov [#allocation3]   ;;  %s45_s7 = sshll.u32 %s540_s3, 4  ;;  %s46_s7 = int_to_ptr.hbm [resolvable:$true] %s45_s7 }
   0x7   :  { %s19_s29 = sshll.u32 %s484_s28, 4  ;;  %s485_s1 = smov [#allocation8]   ;;  %s20_s29 = int_to_ptr.vmem [resolvable:$true] %s19_s29 }
   0x8   :  { %25 = dma.hbm_to_vmem [thread:$0]  %s18_s25, 128, %s20_s29, [#allocation4], %s482_s26, %s482_s26, %s483_s27  }
   0x9   :  { %s47_s8 = sshll.u32 %s485_s1, 4  ;;  %s48_s8 = int_to_ptr.vmem [resolvable:$true] %s47_s8 }
   0xa   :  { %53 = dma.hbm_to_vmem [thread:$0]  %s46_s7, 1024, %s48_s8, [#allocation7], %s482_s26, %s482_s26, %s483_s27  }
   0xb   :  { %475 = dma.done.wait [#allocation4], 128  }
   0xc   :  { %476 = vsyncadd [#allocation4], 4294967168 }
   0xd   :  { %477 = dma.done.wait [#allocation7], 2048  }
   0xe   :  { %478 = vsyncadd [#allocation7], 4294965248  ;;  %v360_v0 = vld [vmem:[#allocation6 + $0x38] sm:$0xff]  ;;  %v359_v1 = vld [vmem:[#allocation6 + $0x30] sm:$0xff]  ;;  %s486_s11 = smov [#allocation9]   ;;  %s487_s15 = smov 128  }
   0xf   :  { %148 = vmatpush.bf16.msra.mxu0 %v360_v0  ;;  %v368_v2 = vld [vmem:[#allocation8 + $0x38] sm:$0xff]  ;;  %v367_v3 = vld [vmem:[#allocation8 + $0x30] sm:$0xff]  ;;  %v358_v4 = vld [vmem:[#allocation6 + $0x28] sm:$0xff]  ;;  %s268_s12 = sshll.u32 %s486_s11, 4  ;;  %s488_s16 = smov 8   ;;  %s269_s12 = int_to_ptr.vmem [resolvable:$true] %s268_s12 }
  0x10   :  { %248 = vmatpush.bf16.msra.mxu1 %v368_v2  ;;  %v366_v5 = vld [vmem:[#allocation8 + $0x28] sm:$0xff]  ;;  %v357_v6 = vld [vmem:[#allocation6 + $0x20] sm:$0xff]  ;;  %v356_v8 = vld [vmem:[#allocation6 + $0x18] sm:$0xff] }
  0x11   :  { %v365_v7 = vld [vmem:[#allocation8 + $0x20] sm:$0xff]  ;;  %v355_v9 = vld [vmem:[#allocation6 + $0x10] sm:$0xff]  ;;  %v354_v10 = vld [vmem:[#allocation6 + $0x8] sm:$0xff] }
  0x12   :  { %v353_v11 = vld [vmem:[#allocation6] sm:$0xff]  ;;  %v352_v12 = vld [vmem:[#allocation3] sm:$0xff]  ;;  %v363_v14 = vld [vmem:[#allocation8 + $0x10] sm:$0xff] }
  0x13   :  { %149 = vmatpush.bf16.msra.mxu0 %v359_v1  ;;  %v364_v13 = vld [vmem:[#allocation8 + $0x18] sm:$0xff]  ;;  %v362_v15 = vld [vmem:[#allocation8 + $0x8] sm:$0xff]  ;;  %v361_v16 = vld [vmem:[#allocation8] sm:$0xff] }
  0x14   :  { %249 = vmatpush.bf16.msra.mxu1 %v367_v3  ;;  %v377_v18 = vld [vmem:[%s539_s2] ss:$0 sm:$0xff]  ;;  %s270_s2 = sshll.u32 %s542_s5, 4  ;;  %s271_s2 = int_to_ptr.hbm [resolvable:$true] %s270_s2 }
  0x15   :  { %v378_v25 = vld [vmem:[%s541_s4] ss:$0 sm:$0xff] }
  0x17   :  { %150 = vmatpush.bf16.msra.mxu0 %v358_v4 }
  0x18   :  { %250 = vmatpush.bf16.msra.mxu1 %v366_v5 }
  0x1b   :  { %151 = vmatpush.bf16.msra.mxu0 %v357_v6 }
  0x1c   :  { %251 = vmatpush.bf16.msra.mxu1 %v365_v7 }
  0x1f   :  { %152 = vmatpush.bf16.msra.mxu0 %v356_v8 }
  0x20   :  { %252 = vmatpush.bf16.msra.mxu1 %v364_v13 }
  0x23   :  { %153 = vmatpush.bf16.msra.mxu0 %v355_v9 }
  0x24   :  { %253 = vmatpush.bf16.msra.mxu1 %v363_v14 }
  0x27   :  { %154 = vmatpush.bf16.msra.mxu0 %v354_v10 }
  0x28   :  { %254 = vmatpush.bf16.msra.mxu1 %v362_v15 }
  0x2b   :  { %155 = vmatpush.bf16.msra.mxu0 %v353_v11 }
  0x2c   :  { %255 = vmatpush.bf16.msra.mxu1 %v361_v16 }
  0x2e   :  { %156 = vmatmul.bf16.vlgmr.msra.gmra.mxu0 %v352_v12 }
  0xab   :  { %v157_v17 = vpop.f32.mrf.mxu0 }
  0xac   :  { %v175_v19 = vadd.f32 %v377_v18, %v157_v17 }
  0xae   :  { %v177_v22 = vmax.f32 %v175_v19, 0.0 }
  0xb3   :  { %v159_v20 = vpop.f32.mrf.mxu0 }
  0xb4   :  { %v176_v21 = vadd.f32 %v377_v18, %v159_v20 }
  0xb6   :  { %v178_v23 = vmax.f32 %v176_v21, 0.0 }
  0xb8   :  { %v179_v24 = vpack.c.bf16 %v178_v23, %v177_v22 }
  0xba   :  { %256 = vmatmul.bf16.vlgmr.msra.gmra.mxu1 %v179_v24 }
 0x137   :  { %v257_v26 = vpop.f32.mrf.mxu1 }
 0x138   :  { %v258_v27 = vadd.f32 %v378_v25, %v257_v26 }
 0x13a   :  { %262 = vst [vmem:[#allocation9] sm:$0xff] %v258_v27 }
 0x13f   :  { %v259_v28 = vpop.f32.mrf.mxu1 }
 0x140   :  { %v260_v29 = vadd.f32 %v378_v25, %v259_v28 }
 0x142   :  { %263 = vst [vmem:[#allocation9 + $0x8] sm:$0xff] %v260_v29 }
 0x143   :  { %276 = dma.vmem_to_hbm [thread:$0]  %s269_s12, 256, %s271_s2, [#allocation5], %s487_s15, %s487_s15, %s488_s16  }
 0x144   :  { %479 = dma.done.wait [#allocation5], 256  }
 0x145   :  { %480 = vsyncadd [#allocation5], 4294967040 }
 0x146   :  { %281 = vsyncpa [#allocation4], 1 }
 0x147   :  { %282 = vsyncpa [#allocation7], 1 }
 0x148   :  { %283 = vsyncpa [#allocation5], 1 }

</bundles_post_ra>
